<compile_context>
chip_gen: v7x
topology: tpu7x:2x2x1
jax: 0.10.0
libtpu: 0.0.40
codegen_flags: <defaults>
</compile_context>

<pallas_src>
import functools
import math
from typing import List, Union

import jax
import jax.numpy as jnp
from jax.experimental import pallas as pl
from jax.experimental.pallas import tpu as pltpu


def _list_check(h: Union[int, List[int]]) -> List[int]:
    return [h] if isinstance(h, int) else list(h)


def _round_up(n: int, m: int) -> int:
    return ((n + m - 1) // m) * m


# ----------------------------- Pallas kernel ------------------------------ #
def _make_fused_mlp_kernel(num_layers: int):
    """Kernel computing  h = relu(h @ W_i + b_i)  for i = 0..L-1, fully in VMEM."""
    assert num_layers >= 1, "mlpModel needs at least one Linear layer"

    def kernel(*refs):
        # refs = (x, w0, b0, w1, b1, ..., w_{L-1}, b_{L-1}, out)
        x_ref = refs[0]
        o_ref = refs[-1]
        h = x_ref[...]                                   # bf16 (bm, d0)
        acc = None
        for i in range(num_layers):
            w = refs[1 + 2 * i][...]                     # bf16 (d_i, d_{i+1})
            b = refs[2 + 2 * i][...]                     # f32  (1,  d_{i+1})
            acc = jnp.dot(h, w, preferred_element_type=jnp.float32)  # MXU, f32 acc
            acc = jnp.maximum(acc + b, 0.0)              # f32 bias + ReLU epilogue
            h = acc.astype(jnp.bfloat16)                 # bf16 feed to next MXU
        o_ref[...] = acc.astype(o_ref.dtype)

    return kernel


def fused_mlp(xp: jax.Array, packed_w, packed_b, bm: int) -> jax.Array:
    """Single fused pallas_call over all layers; batch tiled on a parallel grid."""
    num_layers = len(packed_w)
    bp_rows, d_in_p = xp.shape
    d_out_p = packed_w[-1].shape[1]
    grid = (bp_rows // bm,)

    args = [xp]
    in_specs = [pl.BlockSpec((bm, d_in_p), lambda i: (i, 0))]

    flops = 0
    bytes_accessed = xp.size * xp.dtype.itemsize
    vmem_bytes = 2 * bm * d_in_p * 2                     # double-buffered bf16 input
    for wp, bb in zip(packed_w, packed_b):
        args.extend([wp, bb])
        in_specs.append(pl.BlockSpec(wp.shape, lambda i: (0, 0)))
        in_specs.append(pl.BlockSpec(bb.shape, lambda i: (0, 0)))
        flops += 2 * bp_rows * wp.shape[0] * wp.shape[1]
        bytes_accessed += wp.size * wp.dtype.itemsize + bb.size * bb.dtype.itemsize
        vmem_bytes += 2 * (wp.size * 2 + bb.size * 4) + bm * wp.shape[1] * 4
    bytes_accessed += bp_rows * d_out_p * 2              # bf16 output
    vmem_bytes += 2 * bm * d_out_p * 2

    # >= 32 MiB everywhere (raises v5e's 16 MiB scoped default), capped for v7x.
    vmem_limit = max(32 * 1024 * 1024, min(2 * vmem_bytes, 64 * 1024 * 1024))

    return pl.pallas_call(
        _make_fused_mlp_kernel(num_layers),
        out_shape=jax.ShapeDtypeStruct((bp_rows, d_out_p), jnp.bfloat16),
        grid=grid,
        in_specs=in_specs,
        out_specs=pl.BlockSpec((bm, d_out_p), lambda i: (i, 0)),
        compiler_params=pltpu.CompilerParams(
            dimension_semantics=("parallel",),
            vmem_limit_bytes=vmem_limit,
        ),
        cost_estimate=pl.CostEstimate(
            flops=flops, transcendentals=0, bytes_accessed=bytes_accessed
        ),
    )(*args)


# --------------------------- params & wrappers ----------------------------- #
def init_mlp_params(key, in_neurons: int, hidden_neurons, out_neurons: int):
    """nn.Linear-style init: U(-1/sqrt(fan_in), +1/sqrt(fan_in)). Weight is (in, out)."""
    hidden_neurons = _list_check(hidden_neurons)
    dims = [in_neurons] + hidden_neurons + [out_neurons]
    params = []
    for in_n, out_n in zip(dims, dims[1:]):
        key, kw, kb = jax.random.split(key, 3)
        bound = 1.0 / math.sqrt(in_n)
        w = jax.random.uniform(kw, (in_n, out_n), jnp.float32, -bound, bound)
        b = jax.random.uniform(kb, (out_n,), jnp.float32, -bound, bound)
        params.append((w, b))
    return params


def pack_params(params):
    """Zero-pad feature dims to multiples of 128 (lane-dense), weights -> bf16, bias f32."""
    packed_w, packed_b = [], []
    for w, b in params:
        in_n, out_n = w.shape
        in_p, out_p = _round_up(in_n, 128), _round_up(out_n, 128)
        wp = jnp.zeros((in_p, out_p), jnp.bfloat16).at[:in_n, :out_n].set(
            w.astype(jnp.bfloat16)
        )
        bp = jnp.zeros((1, out_p), jnp.float32).at[0, :out_n].set(b)
        packed_w.append(wp)
        packed_b.append(bp)
    return packed_w, packed_b


@functools.partial(jax.jit, static_argnames=("out_neurons",))
def mlp_forward(x: jax.Array, packed_w, packed_b, out_neurons: int) -> jax.Array:
    """y = relu(...relu(relu(x @ W0 + b0) @ W1 + b1)... @ WL + bL), bf16 output.

    Entire path (pad -> fused kernel -> slice) fuses under one jit.
    """
    B, d_in = x.shape
    d_in_p = packed_w[0].shape[0]
    # bf16 vregs pack (16,128): pad batch to a multiple of 16 sublanes.
    bp_rows = _round_up(max(B, 16), 16)
    bm = bp_rows if bp_rows <= 256 else 256              # batch tile for the grid
    bp_rows = _round_up(bp_rows, bm)
    xp = jnp.zeros((bp_rows, d_in_p), jnp.bfloat16).at[:B, :d_in].set(
        x.astype(jnp.bfloat16)
    )
    yp = fused_mlp(xp, packed_w, packed_b, bm)
    return yp[:B, :out_neurons]


# --------------------------------- main ------------------------------------ #
if __name__ == "__main__":
    key = jax.random.PRNGKey(0)
    kx, kp = jax.random.split(key)

    batch = 4
    in_neurons = 16
    hidden_neurons = [32, 64]
    out_neurons = 8

    x = jax.random.normal(kx, (batch, in_neurons), jnp.float32)
    params = init_mlp_params(kp, in_neurons, hidden_neurons, out_neurons)
    packed_w, packed_b = pack_params(params)

    y = mlp_forward(x, packed_w, packed_b, out_neurons)
    y = jax.block_until_ready(y)

    # ---- sanity: shape & ReLU non-negativity -------------------------------
    assert y.shape == (batch, out_neurons)
    y32 = y.astype(jnp.float32)
    assert bool(jnp.all(y32 >= 0.0))

    # ---- reference 1: identical padded bf16 math in plain JAX (tight) ------
    bp_rows = _round_up(max(batch, 16), 16)
    ref = jnp.zeros((bp_rows, packed_w[0].shape[0]), jnp.bfloat16).at[
        :batch, :in_neurons
    ].set(x.astype(jnp.bfloat16))
    acc = None
    for wp, bb in zip(packed_w, packed_b):
        acc = jnp.maximum(jnp.dot(ref, wp, preferred_element_type=jnp.float32) + bb, 0.0)
        ref = acc.astype(jnp.bfloat16)
    ref_bf16 = ref[:batch, :out_neurons].astype(jnp.float32)   # bf16-rounded like kernel
    assert bool(jnp.allclose(y32, ref_bf16, atol=1e-2, rtol=1e-2))

    # ---- reference 2: full-f32 module semantics (loose, bf16 compute) ------
    ref32 = x
    for w, b in params:
        ref32 = jnp.maximum(ref32 @ w + b[None, :], 0.0)
    assert bool(jnp.allclose(y32, ref32, atol=1e-1, rtol=1e-1))

    print("KERNEL_OK")
</pallas_src>

<mosaic_0001>
module attributes {stable_mosaic.version = 11 : i64} {
  func.func @kernel(%arg0: i32, %arg1: memref<16x128xbf16, #tpu.memory_space<vmem>>, %arg2: memref<128x128xbf16, #tpu.memory_space<vmem>>, %arg3: memref<1x128xf32, #tpu.memory_space<vmem>>, %arg4: memref<128x128xbf16, #tpu.memory_space<vmem>>, %arg5: memref<1x128xf32, #tpu.memory_space<vmem>>, %arg6: memref<128x128xbf16, #tpu.memory_space<vmem>>, %arg7: memref<1x128xf32, #tpu.memory_space<vmem>>, %arg8: memref<16x128xbf16, #tpu.memory_space<vmem>>) attributes {dimension_semantics = [#tpu.dimension_semantics<parallel>], iteration_bounds = array<i64: 1>, scalar_prefetch = 0 : i64, scratch_operands = 0 : i64, tpu.core_type = #tpu.core_type<tc>, window_params = [{transform_indices = @transform_0, window_bounds = array<i64: 16, 128>}, {pipeline_mode = #tpu.pipeline_mode<synchronous>, transform_indices = @transform_1, window_bounds = array<i64: 128, 128>}, {pipeline_mode = #tpu.pipeline_mode<synchronous>, transform_indices = @transform_2, window_bounds = array<i64: 1, 128>}, {pipeline_mode = #tpu.pipeline_mode<synchronous>, transform_indices = @transform_3, window_bounds = array<i64: 128, 128>}, {pipeline_mode = #tpu.pipeline_mode<synchronous>, transform_indices = @transform_4, window_bounds = array<i64: 1, 128>}, {pipeline_mode = #tpu.pipeline_mode<synchronous>, transform_indices = @transform_5, window_bounds = array<i64: 128, 128>}, {pipeline_mode = #tpu.pipeline_mode<synchronous>, transform_indices = @transform_6, window_bounds = array<i64: 1, 128>}, {transform_indices = @transform_7, window_bounds = array<i64: 16, 128>}]} {
    %c0 = arith.constant 0 : index
    %c0_0 = arith.constant 0 : index
    %0 = vector.load %arg1[%c0, %c0_0] : memref<16x128xbf16, #tpu.memory_space<vmem>>, vector<16x128xbf16>
    %c0_1 = arith.constant 0 : index
    %c0_2 = arith.constant 0 : index
    %1 = vector.load %arg2[%c0_1, %c0_2] : memref<128x128xbf16, #tpu.memory_space<vmem>>, vector<128x128xbf16>
    %c0_3 = arith.constant 0 : index
    %c0_4 = arith.constant 0 : index
    %2 = vector.load %arg3[%c0_3, %c0_4] : memref<1x128xf32, #tpu.memory_space<vmem>>, vector<1x128xf32>
    %cst = arith.constant dense<0.000000e+00> : vector<16x128xf32>
    %3 = tpu.matmul %0, %1, %cst {dimension_numbers = #tpu.dot_dimension_numbers<[1], [0], [0], [1], [0, 0, 1, 1], [], []>} : vector<16x128xbf16>, vector<128x128xbf16>, vector<16x128xf32> -> vector<16x128xf32>
    %4 = vector.broadcast %2 : vector<1x128xf32> to vector<16x128xf32>
    %5 = arith.addf %3, %4 : vector<16x128xf32>
    %cst_5 = arith.constant 0.000000e+00 : f32
    %6 = vector.broadcast %cst_5 : f32 to vector<16x128xf32>
    %7 = arith.maximumf %5, %6 : vector<16x128xf32>
    %8 = arith.truncf %7 : vector<16x128xf32> to vector<16x128xbf16>
    %c0_6 = arith.constant 0 : index
    %c0_7 = arith.constant 0 : index
    %9 = vector.load %arg4[%c0_6, %c0_7] : memref<128x128xbf16, #tpu.memory_space<vmem>>, vector<128x128xbf16>
    %c0_8 = arith.constant 0 : index
    %c0_9 = arith.constant 0 : index
    %10 = vector.load %arg5[%c0_8, %c0_9] : memref<1x128xf32, #tpu.memory_space<vmem>>, vector<1x128xf32>
    %cst_10 = arith.constant dense<0.000000e+00> : vector<16x128xf32>
    %11 = tpu.matmul %8, %9, %cst_10 {dimension_numbers = #tpu.dot_dimension_numbers<[1], [0], [0], [1], [0, 0, 1, 1], [], []>} : vector<16x128xbf16>, vector<128x128xbf16>, vector<16x128xf32> -> vector<16x128xf32>
    %12 = vector.broadcast %10 : vector<1x128xf32> to vector<16x128xf32>
    %13 = arith.addf %11, %12 : vector<16x128xf32>
    %cst_11 = arith.constant 0.000000e+00 : f32
    %14 = vector.broadcast %cst_11 : f32 to vector<16x128xf32>
    %15 = arith.maximumf %13, %14 : vector<16x128xf32>
    %16 = arith.truncf %15 : vector<16x128xf32> to vector<16x128xbf16>
    %c0_12 = arith.constant 0 : index
    %c0_13 = arith.constant 0 : index
    %17 = vector.load %arg6[%c0_12, %c0_13] : memref<128x128xbf16, #tpu.memory_space<vmem>>, vector<128x128xbf16>
    %c0_14 = arith.constant 0 : index
    %c0_15 = arith.constant 0 : index
    %18 = vector.load %arg7[%c0_14, %c0_15] : memref<1x128xf32, #tpu.memory_space<vmem>>, vector<1x128xf32>
    %cst_16 = arith.constant dense<0.000000e+00> : vector<16x128xf32>
    %19 = tpu.matmul %16, %17, %cst_16 {dimension_numbers = #tpu.dot_dimension_numbers<[1], [0], [0], [1], [0, 0, 1, 1], [], []>} : vector<16x128xbf16>, vector<128x128xbf16>, vector<16x128xf32> -> vector<16x128xf32>
    %20 = vector.broadcast %18 : vector<1x128xf32> to vector<16x128xf32>
    %21 = arith.addf %19, %20 : vector<16x128xf32>
    %cst_17 = arith.constant 0.000000e+00 : f32
    %22 = vector.broadcast %cst_17 : f32 to vector<16x128xf32>
    %23 = arith.maximumf %21, %22 : vector<16x128xf32>
    %24 = arith.truncf %23 : vector<16x128xf32> to vector<16x128xbf16>
    %c0_18 = arith.constant 0 : index
    %c0_19 = arith.constant 0 : index
    %25 = vector.load %arg8[%c0_18, %c0_19] : memref<16x128xbf16, #tpu.memory_space<vmem>>, vector<16x128xbf16>
    tpu.vector_store %arg8[%c0_18, %c0_19], %24 {strides = array<i32>} : memref<16x128xbf16, #tpu.memory_space<vmem>>, vector<16x128xbf16>,
    return
  }
  func.func @transform_0(%arg0: i32) -> (i32, i32) {
    %c0_i32 = arith.constant 0 : i32
    %c0_i32_0 = arith.constant 0 : i32
    return %arg0, %c0_i32 : i32, i32
  }
  func.func @transform_1(%arg0: i32) -> (i32, i32) {
    %c0_i32 = arith.constant 0 : i32
    %c0_i32_0 = arith.constant 0 : i32
    %c0_i32_1 = arith.constant 0 : i32
    return %c0_i32, %c0_i32_0 : i32, i32
  }
  func.func @transform_2(%arg0: i32) -> (i32, i32) {
    %c0_i32 = arith.constant 0 : i32
    %c0_i32_0 = arith.constant 0 : i32
    %c0_i32_1 = arith.constant 0 : i32
    return %c0_i32, %c0_i32_0 : i32, i32
  }
  func.func @transform_3(%arg0: i32) -> (i32, i32) {
    %c0_i32 = arith.constant 0 : i32
    %c0_i32_0 = arith.constant 0 : i32
    %c0_i32_1 = arith.constant 0 : i32
    return %c0_i32, %c0_i32_0 : i32, i32
  }
  func.func @transform_4(%arg0: i32) -> (i32, i32) {
    %c0_i32 = arith.constant 0 : i32
    %c0_i32_0 = arith.constant 0 : i32
    %c0_i32_1 = arith.constant 0 : i32
    return %c0_i32, %c0_i32_0 : i32, i32
  }
  func.func @transform_5(%arg0: i32) -> (i32, i32) {
    %c0_i32 = arith.constant 0 : i32
    %c0_i32_0 = arith.constant 0 : i32
    %c0_i32_1 = arith.constant 0 : i32
    return %c0_i32, %c0_i32_0 : i32, i32
  }
  func.func @transform_6(%arg0: i32) -> (i32, i32) {
    %c0_i32 = arith.constant 0 : i32
    %c0_i32_0 = arith.constant 0 : i32
    %c0_i32_1 = arith.constant 0 : i32
    return %c0_i32, %c0_i32_0 : i32, i32
  }
  func.func @transform_7(%arg0: i32) -> (i32, i32) {
    %c0_i32 = arith.constant 0 : i32
    %c0_i32_0 = arith.constant 0 : i32
    return %arg0, %c0_i32 : i32, i32
  }
}

</mosaic_0001>

<bundles_post_ra>
// kernel: mlp_forward.1
= control target key start
LH: loop header
LB: loop body
LE: loop exit
PB: predicated region body
PF: predicated region fallthrough
CT: control target
= control target key end

     0   :  { %12 = vsyncpa [#allocation3], 0  ;;  %s806_s0 = inlined_call_operand.vmem [shape: bf16[16,128], index: 0, kind: input, shape index: {}]   ;;  %s807_s1 = inlined_call_operand.hbm [shape: bf16[128,128], index: 1, kind: input, shape index: {}]   ;;  %s808_s2 = inlined_call_operand.vmem [shape: f32[1,128], index: 2, kind: input, shape index: {}]   ;;  %s809_s3 = inlined_call_operand.hbm [shape: bf16[128,128], index: 3, kind: input, shape index: {}]   ;;  %s810_s4 = inlined_call_operand.vmem [shape: f32[1,128], index: 4, kind: input, shape index: {}]   ;;  %s811_s5 = inlined_call_operand.hbm [shape: bf16[128,128], index: 5, kind: input, shape index: {}]   ;;  %s812_s6 = inlined_call_operand.vmem [shape: f32[1,128], index: 6, kind: input, shape index: {}]   ;;  %s813_s7 = inlined_call_operand.vmem [shape: bf16[16,128], index: 7, kind: output, shape index: {}]  }
   0x1   :  { %13 = vsyncpa [#allocation5], 0  ;;  %s662_s24 = smov [#allocation4]   ;;  %s663_s26 = smov [#allocation2]  }
   0x2   :  { %s35_s25 = sshll.u32 %s662_s24, 4  ;;  %s21_s27 = sshll.u32 %s663_s26, 4  ;;  %s36_s25 = int_to_ptr.vmem [resolvable:$true] %s35_s25  ;;  %s709_s27 = int_to_ptr.vmem [resolvable:$true] %s21_s27 }
   0x3   :  { %s592_s30 = scalar_lea.hbm %s809_s3, 1024 }
   0x4   :  { %p593_p0 = scmp.ne.s32.totalorder %s809_s3, %s592_s30  ;;  %p596_p1 = scmp.lt.u32.totalorder %s592_s30, %s809_s3 }
   0x6   :  { %p598_p2 = pnand %p596_p1, %p593_p0 }
   0x8   :  { %601 = shalt.err (!%p598_p2)
}
   0x9   :  { %s602_s12 = scalar_lea.vmem %s36_s25, 1024  ;;  %p607_p4 = scmp.lt.s32.totalorder %s36_s25, %s36_s25 }
   0xa   :  { %p603_p3 = scmp.ne.s32.totalorder %s36_s25, %s602_s12  ;;  %p608_p5 = scmp.lt.s32.totalorder %s602_s12, %s602_s12 }
   0xc   :  { %p609_p6 = por %p608_p5, %p607_p4 }
   0xe   :  { %p610_p7 = pnand %p609_p6, %p603_p3 }
  0x10   :  { %613 = shalt.err (!%p610_p7)
}
  0x11   :  { %s664_s13 = smov 64   ;;  %s665_s14 = smov 4  }
  0x12   :  { %41 = dma.hbm_to_vmem [thread:$0]  %s809_s3, 1024, %s36_s25, [#allocation5], %s664_s13, %s664_s13, %s665_s14  }
  0x13   :  { %s614_s19 = scalar_lea.hbm %s807_s1, 1024 }
  0x14   :  { %p615_p8 = scmp.ne.s32.totalorder %s807_s1, %s614_s19  ;;  %p618_p9 = scmp.lt.u32.totalorder %s614_s19, %s807_s1 }
  0x16   :  { %p620_p10 = pnand %p618_p9, %p615_p8 }
  0x18   :  { %623 = shalt.err (!%p620_p10)
}
  0x19   :  { %s624_s24 = scalar_lea.vmem %s709_s27, 1024  ;;  %p629_p12 = scmp.lt.s32.totalorder %s709_s27, %s709_s27 }
  0x1a   :  { %p625_p11 = scmp.ne.s32.totalorder %s709_s27, %s624_s24  ;;  %p630_p13 = scmp.lt.s32.totalorder %s624_s24, %s624_s24 }
  0x1c   :  { %p631_p0 = por %p630_p13, %p629_p12 }
  0x1e   :  { %p632_p1 = pnand %p631_p0, %p625_p11 }
  0x20   :  { %635 = shalt.err (!%p632_p1)
}
  0x21   :  { %27 = dma.hbm_to_vmem [thread:$0]  %s807_s1, 1024, %s709_s27, [#allocation3], %s664_s13, %s664_s13, %s665_s14  }
  0x22   :  { %s666_s26 = smov [#allocation6]   ;;  %s636_s8 = scalar_lea.hbm %s811_s5, 1024 }
  0x23   :  { %s49_s28 = sshll.u32 %s666_s26, 4  ;;  %p637_p2 = scmp.ne.s32.totalorder %s811_s5, %s636_s8  ;;  %s50_s28 = int_to_ptr.vmem [resolvable:$true] %s49_s28 }
  0x24   :  { %p640_p3 = scmp.lt.u32.totalorder %s636_s8, %s811_s5 }
  0x26   :  { %p642_p4 = pnand %p640_p3, %p637_p2 }
  0x28   :  { %645 = shalt.err (!%p642_p4)
}
  0x29   :  { %s646_s15 = scalar_lea.vmem %s50_s28, 1024  ;;  %p651_p6 = scmp.lt.s32.totalorder %s50_s28, %s50_s28 }
  0x2a   :  { %p647_p5 = scmp.ne.s32.totalorder %s50_s28, %s646_s15  ;;  %p652_p7 = scmp.lt.s32.totalorder %s646_s15, %s646_s15 }
  0x2c   :  { %p653_p8 = por %p652_p7, %p651_p6 }
  0x2e   :  { %p654_p9 = pnand %p653_p8, %p647_p5 }
  0x30   :  { %657 = shalt.err (!%p654_p9)
}
  0x31   :  { %55 = dma.hbm_to_vmem [thread:$0]  %s811_s5, 1024, %s50_s28, [#allocation5], %s664_s13, %s664_s13, %s665_s14  }
  0x32   :  { %658 = dma.done.wait [#allocation3], 1024  }
  0x33   :  { %659 = vsyncadd [#allocation3], 4294966272 }
  0x34   :  { %660 = dma.done.wait [#allocation5], 2048  }
  0x35   :  { %661 = vsyncadd [#allocation5], 4294965248  ;;  %v667_v0 = vmov 0.0   ;;  %vm668_vm0 = vmmov 0   ;;  %v567_v1 = vld [vmem:[#allocation2] sm:$0xff]   ;;  %v568_v2 = vld [vmem:[#allocation2 + $0x8] sm:$0xff]  }
  0x36   :  { %500 = vmatprep.subr.bf16.mxu0 %v667_v0  ;;  %516 = vmatprep.mubr.msk.bf16.mxu0 %vm668_vm0, %v667_v0  ;;  %v569_v3 = vld [vmem:[#allocation2 + $0x10] sm:$0xff]   ;;  %v576_v4 = vld [vmem:[#allocation4] sm:$0xff]   ;;  %v570_v5 = vld [vmem:[#allocation2 + $0x18] sm:$0xff]  }
  0x37   :  { %520 = vmatprep.subr.bf16.mxu1 %v667_v0  ;;  %536 = vmatprep.mubr.msk.bf16.mxu1 %vm668_vm0, %v667_v0  ;;  %v577_v6 = vld [vmem:[#allocation4 + $0x8] sm:$0xff]   ;;  %v571_v7 = vld [vmem:[#allocation2 + $0x20] sm:$0xff]   ;;  %v578_v8 = vld [vmem:[#allocation4 + $0x10] sm:$0xff]  }
  0x38   :  { %501 = vmatpush3.bf16.msra.mxu0 %v567_v1  ;;  %521 = vmatpush3.bf16.msra.mxu1 %v576_v4  ;;  %v572_v9 = vld [vmem:[#allocation2 + $0x28] sm:$0xff]   ;;  %v579_v10 = vld [vmem:[#allocation4 + $0x18] sm:$0xff]   ;;  %v573_v11 = vld [vmem:[#allocation2 + $0x30] sm:$0xff]  }
  0x39   :  { %502 = vmatprep.subr.bf16.mxu0 %v667_v0  ;;  %522 = vmatprep.subr.bf16.mxu1 %v667_v0  ;;  %v580_v12 = vld [vmem:[#allocation4 + $0x20] sm:$0xff]   ;;  %v574_v13 = vld [vmem:[#allocation2 + $0x38] sm:$0xff]   ;;  %v581_v14 = vld [vmem:[#allocation4 + $0x28] sm:$0xff]  }
  0x3a   :  { %v575_v15 = vld [vmem:[%s806_s0] sm:$0xff]   ;;  %v582_v16 = vld [vmem:[#allocation4 + $0x30] sm:$0xff]   ;;  %v583_v17 = vld [vmem:[#allocation4 + $0x38] sm:$0xff]  }
  0x3b   :  { %v584_v18 = vld [vmem:[#allocation6] sm:$0xff]   ;;  %v585_v19 = vld [vmem:[#allocation6 + $0x8] sm:$0xff]   ;;  %v586_v20 = vld [vmem:[#allocation6 + $0x10] sm:$0xff]  }
  0x3c   :  { %503 = vmatpush3.bf16.msra.mxu0 %v568_v2  ;;  %523 = vmatpush3.bf16.msra.mxu1 %v577_v6  ;;  %v587_v21 = vld [vmem:[#allocation6 + $0x18] sm:$0xff]   ;;  %v588_v22 = vld [vmem:[#allocation6 + $0x20] sm:$0xff]   ;;  %v589_v23 = vld [vmem:[#allocation6 + $0x28] sm:$0xff]  }
  0x3d   :  { %504 = vmatprep.subr.bf16.mxu0 %v667_v0  ;;  %524 = vmatprep.subr.bf16.mxu1 %v667_v0  ;;  %v436_v24 = vld [vmem:[%s808_s2] ss:$0 sm:$0xff]  ;;  %v590_v34 = vld [vmem:[#allocation6 + $0x30] sm:$0xff]   ;;  %v591_v35 = vld [vmem:[#allocation6 + $0x38] sm:$0xff]  }
  0x3e   :  { %v446_v36 = vld [vmem:[%s810_s4] ss:$0 sm:$0xff] }
  0x3f   :  { %v455_v46 = vld [vmem:[%s812_s6] ss:$0 sm:$0xff] }
  0x40   :  { %505 = vmatpush3.bf16.msra.mxu0 %v569_v3  ;;  %525 = vmatpush3.bf16.msra.mxu1 %v578_v8 }
  0x41   :  { %506 = vmatprep.subr.bf16.mxu0 %v667_v0  ;;  %526 = vmatprep.subr.bf16.mxu1 %v667_v0 }
  0x44   :  { %507 = vmatpush3.bf16.msra.mxu0 %v570_v5  ;;  %527 = vmatpush3.bf16.msra.mxu1 %v579_v10 }
  0x45   :  { %508 = vmatprep.subr.bf16.mxu0 %v667_v0  ;;  %528 = vmatprep.subr.bf16.mxu1 %v667_v0 }
  0x48   :  { %509 = vmatpush3.bf16.msra.mxu0 %v571_v7  ;;  %529 = vmatpush3.bf16.msra.mxu1 %v580_v12 }
  0x49   :  { %510 = vmatprep.subr.bf16.mxu0 %v667_v0  ;;  %530 = vmatprep.subr.bf16.mxu1 %v667_v0 }
  0x4c   :  { %511 = vmatpush3.bf16.msra.mxu0 %v572_v9  ;;  %531 = vmatpush3.bf16.msra.mxu1 %v581_v14 }
  0x4d   :  { %512 = vmatprep.subr.bf16.mxu0 %v667_v0  ;;  %532 = vmatprep.subr.bf16.mxu1 %v667_v0 }
  0x50   :  { %513 = vmatpush3.bf16.msra.mxu0 %v573_v11  ;;  %533 = vmatpush3.bf16.msra.mxu1 %v582_v16 }
  0x51   :  { %514 = vmatprep.subr.bf16.mxu0 %v667_v0  ;;  %534 = vmatprep.subr.bf16.mxu1 %v667_v0 }
  0x54   :  { %515 = vmatpush3.bf16.msra.mxu0 %v574_v13  ;;  %535 = vmatpush3.bf16.msra.mxu1 %v583_v17 }
  0x55   :  { %540 = vmatprep.subr.bf16.mxu0 %v667_v0 }
  0x57   :  { %517 = vmatmul.mubr.bf16.vlgmr.msra.gmra.mrb[0].mxu0 %v575_v15 }
  0x58   :  { %556 = vmatprep.mubr.msk.bf16.mxu0 %vm668_vm0, %v667_v0  ;;  %541 = vmatpush3.bf16.msra.mxu0 %v584_v18 }
  0x59   :  { %542 = vmatprep.subr.bf16.mxu0 %v667_v0 }
  0x5c   :  { %543 = vmatpush3.bf16.msra.mxu0 %v585_v19 }
  0x5d   :  { %544 = vmatprep.subr.bf16.mxu0 %v667_v0 }
  0x60   :  { %545 = vmatpush3.bf16.msra.mxu0 %v586_v20 }
  0x61   :  { %546 = vmatprep.subr.bf16.mxu0 %v667_v0 }
  0x64   :  { %547 = vmatpush3.bf16.msra.mxu0 %v587_v21 }
  0x65   :  { %548 = vmatprep.subr.bf16.mxu0 %v667_v0 }
  0x68   :  { %549 = vmatpush3.bf16.msra.mxu0 %v588_v22 }
  0x69   :  { %550 = vmatprep.subr.bf16.mxu0 %v667_v0 }
  0x6c   :  { %551 = vmatpush3.bf16.msra.mxu0 %v589_v23 }
  0x6d   :  { %552 = vmatprep.subr.bf16.mxu0 %v667_v0 }
  0x70   :  { %553 = vmatpush3.bf16.msra.mxu0 %v590_v34 }
  0x71   :  { %554 = vmatprep.subr.bf16.mxu0 %v667_v0 }
  0x74   :  { %555 = vmatpush3.bf16.msra.mxu0 %v591_v35 }
 0x12a   :  { %v181_v25 = vpop.f32.mrb[0].mxu0 }
 0x12b   :  { %v182_v26 = vadd.f32 %v436_v24, %v181_v25  ;;  %v518_v27 = vpop.f32.mrb[1].mxu0 }
 0x12c   :  { %v184_v28 = vpop.f32.mrb[2].mxu0 }
 0x12d   :  { %v185_v29 = vadd.f32 %v436_v24, %v184_v28  ;;  %v519_v30 = vpop.f32.mrb[3].mxu0  ;;  %v188_v31 = vmax.f32 %v182_v26, 0.0 }
 0x12f   :  { %v189_v32 = vmax.f32 %v185_v29, 0.0 }
 0x131   :  { %v190_v33 = vpack.c.bf16 %v189_v32, %v188_v31 }
 0x133   :  { %537 = vmatmul.mubr.bf16.vlgmr.msra.gmra.mrb[0].mxu1 %v190_v33 }
 0x206   :  { %v296_v37 = vpop.f32.mrb[0].mxu1 }
 0x207   :  { %v297_v38 = vadd.f32 %v446_v36, %v296_v37  ;;  %v538_v39 = vpop.f32.mrb[1].mxu1 }
 0x208   :  { %v299_v40 = vpop.f32.mrb[2].mxu1 }
 0x209   :  { %v300_v41 = vadd.f32 %v446_v36, %v299_v40  ;;  %v539_v42 = vpop.f32.mrb[3].mxu1  ;;  %v303_v43 = vmax.f32 %v297_v38, 0.0 }
 0x20b   :  { %v304_v44 = vmax.f32 %v300_v41, 0.0 }
 0x20d   :  { %v305_v45 = vpack.c.bf16 %v304_v44, %v303_v43 }
 0x20f   :  { %557 = vmatmul.mubr.bf16.vlgmr.msra.gmra.mrb[4].mxu0 %v305_v45 }
 0x2e2   :  { %v411_v47 = vpop.f32.mrb[4].mxu0 }
 0x2e3   :  { %v412_v48 = vadd.f32 %v455_v46, %v411_v47  ;;  %v558_v49 = vpop.f32.mrb[5].mxu0 }
 0x2e4   :  { %v414_v50 = vpop.f32.mrb[6].mxu0 }
 0x2e5   :  { %v415_v51 = vadd.f32 %v455_v46, %v414_v50  ;;  %v559_v52 = vpop.f32.mrb[7].mxu0  ;;  %v418_v53 = vmax.f32 %v412_v48, 0.0 }
 0x2e7   :  { %v419_v54 = vmax.f32 %v415_v51, 0.0 }
 0x2e9   :  { %v471_v55 = vpack.c.bf16 %v419_v54, %v418_v53 }
 0x2eb   :  { %472 = vst [vmem:[%s813_s7] sm:$0xff] %v471_v55  }
 0x2ec   :  { %434 = vsyncpa [#allocation3], 1 }
 0x2ed   :  { %435 = vsyncpa [#allocation5], 1 }

</bundles_post_ra>
